<compile_context>
chip_gen: v7x
topology: tpu7x:2x2x1
jax: 0.10.0
libtpu: 0.0.40
codegen_flags: <defaults>
</compile_context>

<pallas_src>
import functools
import math

import jax
import jax.numpy as jnp
from jax import lax
from jax.experimental import pallas as pl
from jax.experimental.pallas import tpu as pltpu


# ----------------------------- roll convention probe -----------------------------

def _detect_roll_convention():
    """Return True iff pltpu.roll matches jnp.roll (out[j] = x[(j - shift) % n])."""
    def k(x_ref, o_ref):
        o_ref[...] = pltpu.roll(x_ref[...], 1, axis=1)

    x = jnp.broadcast_to(jnp.arange(128, dtype=jnp.float32), (8, 128))
    y = pl.pallas_call(k, out_shape=jax.ShapeDtypeStruct((8, 128), jnp.float32))(x)
    return bool(y[0, 1] == 0.0)


# ------------------------------- fused layer kernel -------------------------------

def _layer_kernel(x_ref, cos_ref, sin_ref, ln1_ref, ln2_ref, lnf_ref,
                  wqkv_ref, bqkv_ref, wo_ref, w1_ref, w2_ref,
                  out_ref, present_ref,
                  *, S, NH, KVH, HD, FFN, eps, roll_jnp, final_norm):
    """One BatGPT layer for one batch element (grid axis = batch).

    RMSNorm -> merged QKV (bf16 MXU) -> RoPE (XLU rolls, f32) -> causal GQA
    attention (batched einsum) -> out proj -> residual -> RMSNorm -> SwiGLU MLP
    -> residual [-> fused ln_f on the last layer].  Also emits (K|V) presents.
    """
    H = NH * HD
    kv_w = KVH * HD
    g = NH // KVH

    x = x_ref[...].astype(jnp.float32)                          # [S, H]

    def rms(v, w):
        var = jnp.mean(v * v, axis=-1, keepdims=True)
        return v * lax.rsqrt(var + eps) * w

    def bf16(v):
        return v.astype(jnp.bfloat16)

    # ---- input RMSNorm + merged QKV projection (+bias) ---------------------------
    ln1 = rms(x, ln1_ref[...])
    qkv = jnp.dot(bf16(ln1), wqkv_ref[...],
                  preferred_element_type=jnp.float32) + bqkv_ref[...]   # [S, H+2*kv_w]

    q = qkv[:, :H]
    k = qkv[:, H:H + kv_w]
    v = qkv[:, H + kv_w:]

    # ---- interleaved RoPE via XLU pair swap (f32) --------------------------------
    # out[2i]   = x[2i]*cos - x[2i+1]*sin
    # out[2i+1] = x[2i+1]*cos + x[2i]*sin
    # partner[j] = x[j+1] at even j, x[j-1] at odd j; sin table is alternating-signed.
    cos_hd = cos_ref[...]                                        # [S, HD]
    sin_hd = sin_ref[...]                                        # [S, HD] (signed)

    def rope(t, n_rep):
        W = t.shape[-1]
        prv = pltpu.roll(t, 1 if roll_jnp else W - 1, axis=1)    # t[j-1]
        nxt = pltpu.roll(t, W - 1 if roll_jnp else 1, axis=1)    # t[j+1]
        lane = lax.broadcasted_iota(jnp.int32, t.shape, 1)
        partner = jnp.where(lane % 2 == 0, nxt, prv)
        cos_f = jnp.concatenate([cos_hd] * n_rep, axis=-1)       # tile over heads
        sin_f = jnp.concatenate([sin_hd] * n_rep, axis=-1)
        return t * cos_f + partner * sin_f

    q = rope(q, NH)
    k = rope(k, KVH)

    # presents = post-rotary K | V (pre GQA expansion), kept on the f32 path.
    present_ref[...] = jnp.concatenate([k, v], axis=-1).astype(present_ref.dtype)

    # ---- causal GQA attention, batched over kv-heads -----------------------------
    scale = 1.0 / math.sqrt(HD)
    # rows of qb are ordered (s, group) -> query position = row // g
    qb = jnp.transpose(q.reshape(S, KVH, g * HD), (1, 0, 2)).reshape(KVH, S * g, HD)
    kb = jnp.transpose(k.reshape(S, KVH, HD), (1, 0, 2))          # [KVH, S, HD]
    vb = jnp.transpose(v.reshape(S, KVH, HD), (1, 0, 2))          # [KVH, S, HD]

    s_ = jnp.einsum('hqd,hkd->hqk', bf16(qb), bf16(kb),
                    preferred_element_type=jnp.float32) * scale   # [KVH, S*g, S]
    q_pos = lax.broadcasted_iota(jnp.int32, (S * g, S), 0) // g
    k_pos = lax.broadcasted_iota(jnp.int32, (S * g, S), 1)
    s_ = jnp.where((k_pos <= q_pos)[None, :, :], s_, jnp.finfo(jnp.float32).min)
    m_ = jnp.max(s_, axis=-1, keepdims=True)
    e_ = jnp.exp(s_ - m_)
    p_ = e_ * pl.reciprocal(jnp.sum(e_, axis=-1, keepdims=True), approx=True)
    ctx = jnp.einsum('hqk,hkd->hqd', bf16(p_), bf16(vb),
                     preferred_element_type=jnp.float32)          # [KVH, S*g, HD]
    ctx = jnp.transpose(ctx.reshape(KVH, S, g, HD), (1, 0, 2, 3)).reshape(S, H)

    # ---- output projection (bias-free) + residual ---------------------------------
    attn_out = jnp.dot(bf16(ctx), wo_ref[...], preferred_element_type=jnp.float32)
    # TODO(synk): hidden_dropout is identity in eval mode; not implemented.
    resid1 = x + attn_out

    # ---- post-attention RMSNorm + SwiGLU MLP + residual ---------------------------
    ln2 = rms(resid1, ln2_ref[...])
    h1 = jnp.dot(bf16(ln2), w1_ref[...], preferred_element_type=jnp.float32)  # [S, 2F]
    a = h1[:, :FFN]
    act = a * jax.nn.sigmoid(a) * h1[:, FFN:]                     # silu(a) * gate
    mlp_out = jnp.dot(bf16(act), w2_ref[...], preferred_element_type=jnp.float32)
    y = resid1 + mlp_out

    if final_norm:                                                # fused ln_f epilogue
        y = rms(y, lnf_ref[...])
    out_ref[...] = y.astype(out_ref.dtype)


# -------------------------------- wrappers (non-hot) --------------------------------

def build_rope_tables(rope_cache, S, HD):
    """[S,1,rot_half,2] rope cache -> per-position [S, HD] cos / signed-sin tables."""
    rot_half = rope_cache.shape[-2]
    rot_dim = rot_half * 2
    cos = rope_cache[:S, 0, :, 0]                                 # [S, rot_half]
    sin = rope_cache[:S, 0, :, 1]
    cos_rep = jnp.repeat(cos, 2, axis=-1)                         # [S, rot_dim]
    sin_signed = jnp.stack([-sin, sin], axis=-1).reshape(S, rot_dim)
    pad = HD - rot_dim
    cos_hd = jnp.concatenate([cos_rep, jnp.ones((S, pad), jnp.float32)], axis=-1)
    sin_hd = jnp.concatenate([sin_signed, jnp.zeros((S, pad), jnp.float32)], axis=-1)
    return cos_hd, sin_hd


def batgpt_layer(lp, x2d, cos_hd, sin_hd, lnf_w, cfg, S, B, *, final_norm, roll_jnp):
    NH, KVH, HD, FFN, EPS = (cfg["n_head"], cfg["kv_heads"], cfg["head_dim"],
                             cfg["ffn"], cfg["eps"])
    H = NH * HD
    kv_w = KVH * HD
    qkv_w = H + 2 * kv_w

    kernel = functools.partial(_layer_kernel, S=S, NH=NH, KVH=KVH, HD=HD, FFN=FFN,
                               eps=EPS, roll_jnp=roll_jnp, final_norm=final_norm)

    def fixed(shape):
        return pl.BlockSpec(shape, lambda b: (0, 0))

    out, present = pl.pallas_call(
        kernel,
        grid=(B,),
        in_specs=[
            pl.BlockSpec((S, H), lambda b: (b, 0)),     # x (batch-major rows)
            fixed((S, HD)),                             # cos table
            fixed((S, HD)),                             # signed sin table
            fixed((1, H)),                              # ln1 weight
            fixed((1, H)),                              # ln2 weight
            fixed((1, H)),                              # ln_f weight (used on last layer)
            fixed((H, qkv_w)),                          # merged QKV weight (bf16)
            fixed((1, qkv_w)),                          # merged QKV bias (f32)
            fixed((H, H)),                              # attention dense (bf16)
            fixed((H, 2 * FFN)),                        # dense_h_to_4h (bf16)
            fixed((FFN, H)),                            # dense_4h_to_h (bf16)
        ],
        out_specs=(
            pl.BlockSpec((S, H), lambda b: (b, 0)),
            pl.BlockSpec((S, 2 * kv_w), lambda b: (b, 0)),
        ),
        out_shape=(jax.ShapeDtypeStruct((B * S, H), x2d.dtype),
                   jax.ShapeDtypeStruct((B * S, 2 * kv_w), x2d.dtype)),
        compiler_params=pltpu.CompilerParams(dimension_semantics=("parallel",)),
    )(x2d, cos_hd, sin_hd,
      lp["ln1_w"].reshape(1, H), lp["ln2_w"].reshape(1, H), lnf_w.reshape(1, H),
      lp["w_qkv"], lp["b_qkv"], lp["wo"], lp["w1"], lp["w2"])
    return out, present


def batgpt_transformer(params, hidden_states, rope_cache, cfg, roll_jnp):
    # attention_mask=None with q_len == kv_len -> causal attention (SDPA path).
    # TODO(synk): incoming kv_caches / non-None attention_mask not implemented.
    S, B, H = hidden_states.shape
    HD = cfg["head_dim"]
    KVH = cfg["kv_heads"]
    kv_w = KVH * HD
    n_layer = len(params["layers"])

    cos_hd, sin_hd = build_rope_tables(rope_cache, S, HD)
    # Batch-major rows (row = b*S + s): batch grid axis -> contiguous sublane blocks.
    x2d = jnp.transpose(hidden_states, (1, 0, 2)).reshape(B * S, H)

    presents = ()
    for i, lp in enumerate(params["layers"]):
        x2d, present = batgpt_layer(lp, x2d, cos_hd, sin_hd, params["ln_f_w"],
                                    cfg, S, B, final_norm=(i == n_layer - 1),
                                    roll_jnp=roll_jnp)
        pres = present.reshape(B, S, 2 * kv_w)
        k_pres = jnp.transpose(pres[..., :kv_w].reshape(B, S, KVH, HD), (1, 0, 2, 3))
        v_pres = jnp.transpose(pres[..., kv_w:].reshape(B, S, KVH, HD), (1, 0, 2, 3))
        presents = presents + ((k_pres, v_pres),)

    out = jnp.transpose(x2d.reshape(B, S, H), (1, 0, 2))
    return out, presents, None, None


# ------------------------------------- setup -------------------------------------

def init_params(key, cfg):
    H, NH, KVH, HD, FFN, NL = (cfg["hidden"], cfg["n_head"], cfg["kv_heads"],
                               cfg["head_dim"], cfg["ffn"], cfg["n_layer"])
    kv_dim = KVH * HD

    def norm(k, shape):
        return 0.02 * jax.random.normal(k, shape, jnp.float32)

    layers = []
    for i in range(NL):
        ks = jax.random.split(jax.random.fold_in(key, i), 8)
        wq, bq = norm(ks[0], (H, H)), norm(ks[1], (1, H))
        wk, bk = norm(ks[2], (H, kv_dim)), norm(ks[3], (1, kv_dim))
        wv, bv = norm(ks[4], (H, kv_dim)), norm(ks[5], (1, kv_dim))
        layers.append(dict(
            ln1_w=jnp.ones((H,), jnp.float32),
            ln2_w=jnp.ones((H,), jnp.float32),
            # merged QKV projection (q | k | v); weights stored bf16 for the MXU
            w_qkv=jnp.concatenate([wq, wk, wv], axis=1).astype(jnp.bfloat16),
            b_qkv=jnp.concatenate([bq, bk, bv], axis=1),            # f32 bias
            wo=norm(ks[6], (H, H)).astype(jnp.bfloat16),             # dense, bias=False
            w1=norm(ks[7], (H, 2 * FFN)).astype(jnp.bfloat16),       # dense_h_to_4h
            w2=norm(jax.random.fold_in(ks[7], 99), (FFN, H)).astype(jnp.bfloat16),
        ))
    return dict(layers=layers, ln_f_w=jnp.ones((H,), jnp.float32))


def build_rope_cache(seq_len, head_dim):
    rot_dim = head_dim // 2
    inv_freq = 1.0 / (10000.0 ** (jnp.arange(0, rot_dim, 2, dtype=jnp.float32) / rot_dim))
    pos = jnp.arange(seq_len, dtype=jnp.float32)
    angles = pos[:, None] * inv_freq[None, :]                       # [S, rot_dim//2]
    cache = jnp.stack([jnp.cos(angles), jnp.sin(angles)], -1)       # [S, rot_dim//2, 2]
    return cache[:, None, :, :]                                     # [S, 1, rot_dim//2, 2]


if __name__ == "__main__":
    # Small config with TPU-native dims: head_dim=128, all lane dims multiples of 128.
    cfg = dict(hidden=256, n_head=2, kv_heads=1, head_dim=128, ffn=256,
               n_layer=2, eps=1e-5)
    S, B = 8, 2

    roll_jnp = _detect_roll_convention()     # one-time pltpu.roll direction probe

    key = jax.random.PRNGKey(0)
    k_in, k_par = jax.random.split(key)
    hidden_states = jax.random.normal(k_in, (S, B, cfg["hidden"]), jnp.float32)
    rope_cache = build_rope_cache(S, cfg["head_dim"])
    params = init_params(k_par, cfg)

    fwd = jax.jit(functools.partial(batgpt_transformer, cfg=cfg, roll_jnp=roll_jnp))
    out, presents, _, _ = fwd(params, hidden_states, rope_cache)
    jax.block_until_ready(out)

    assert out.shape == (S, B, cfg["hidden"])
    assert len(presents) == cfg["n_layer"]
    assert presents[0][0].shape == (S, B, cfg["kv_heads"], cfg["head_dim"])
    assert presents[0][1].shape == (S, B, cfg["kv_heads"], cfg["head_dim"])
    print("KERNEL_OK")
</pallas_src>

<mosaic_0001>
module attributes {stable_mosaic.version = 11 : i64} {
  func.func @k(%arg0: memref<8x128xf32, #tpu.memory_space<vmem>>, %arg1: memref<8x128xf32, #tpu.memory_space<vmem>>) attributes {dimension_semantics = [], scalar_prefetch = 0 : i64, scratch_operands = 0 : i64, tpu.core_type = #tpu.core_type<tc>} {
    %c0 = arith.constant 0 : index
    %c0_0 = arith.constant 0 : index
    %0 = vector.load %arg0[%c0, %c0_0] : memref<8x128xf32, #tpu.memory_space<vmem>>, vector<8x128xf32>
    %c1_i32 = arith.constant 1 : i32
    %1 = tpu.dynamic_rotate %0 by %c1_i32 dim 1 : vector<8x128xf32>, i32 -> vector<8x128xf32>
    %c0_1 = arith.constant 0 : index
    %c0_2 = arith.constant 0 : index
    %2 = vector.load %arg1[%c0_1, %c0_2] : memref<8x128xf32, #tpu.memory_space<vmem>>, vector<8x128xf32>
    tpu.vector_store %arg1[%c0_1, %c0_2], %1 {strides = array<i32>} : memref<8x128xf32, #tpu.memory_space<vmem>>, vector<8x128xf32>,
    return
  }
}

</mosaic_0001>

<bundles_post_ra>
// kernel: tpu_custom_call.1
= control target key start
LH: loop header
LB: loop body
LE: loop exit
PB: predicated region body
PF: predicated region fallthrough
CT: control target
= control target key end

     0   :  { %6 = vsyncpa [#allocation3], 0  ;;  %s128_s0 = inlined_call_operand.hbm [shape: f32[8,128], index: 0, kind: input, shape index: {}]   ;;  %s129_s1 = inlined_call_operand.hbm [shape: f32[8,128], index: 1, kind: output, shape index: {}]  }
   0x1   :  { %7 = vsyncpa [#allocation4], 0  ;;  %s91_s6 = smov [#allocation2]   ;;  %s43_s10 = scalar_lea.hbm %s128_s0, 128 }
   0x2   :  { %s14_s7 = sshll.u32 %s91_s6, 4  ;;  %p44_p0 = scmp.ne.s32.totalorder %s128_s0, %s43_s10  ;;  %s15_s7 = int_to_ptr.vmem [resolvable:$true] %s14_s7 }
   0x3   :  { %p47_p1 = scmp.lt.u32.totalorder %s43_s10, %s128_s0 }
   0x5   :  { %p49_p2 = pnand %p47_p1, %p44_p0 }
   0x7   :  { %52 = shalt.err (!%p49_p2)
}
   0x8   :  { %s53_s15 = scalar_lea.vmem %s15_s7, 128  ;;  %p58_p4 = scmp.lt.s32.totalorder %s15_s7, %s15_s7 }
   0x9   :  { %p54_p3 = scmp.ne.s32.totalorder %s15_s7, %s53_s15  ;;  %p59_p5 = scmp.lt.s32.totalorder %s53_s15, %s53_s15 }
   0xb   :  { %p60_p6 = por %p59_p5, %p58_p4 }
   0xd   :  { %p61_p7 = pnand %p60_p6, %p54_p3 }
   0xf   :  { %64 = shalt.err (!%p61_p7)
}
  0x10   :  { %17 = dma.hbm_to_vmem [thread:$0]  %s128_s0, 128, %s15_s7, [#allocation3]  }
  0x11   :  { %87 = dma.done.wait [#allocation3], 128  }
  0x12   :  { %88 = vsyncadd [#allocation3], 4294967168  ;;  %v21_v0 = vld [vmem:[#allocation2] sm:$0xff]  ;;  %s92_s18 = smov 1   ;;  %s93_s19 = smov [#allocation5]  }
  0x13   :  { %22 = vrot.lane.b32.xlu0 %v21_v0, %s92_s18  ;;  %s31_s20 = sshll.u32 %s93_s19, 4  ;;  %s32_s20 = int_to_ptr.vmem [resolvable:$true] %s31_s20 }
  0x14   :  { %s65_s21 = scalar_lea.vmem %s32_s20, 128  ;;  %p70_p9 = scmp.lt.s32.totalorder %s32_s20, %s32_s20 }
  0x15   :  { %p66_p8 = scmp.ne.s32.totalorder %s32_s20, %s65_s21  ;;  %p71_p10 = scmp.lt.s32.totalorder %s65_s21, %s65_s21 }
  0x17   :  { %p72_p11 = por %p71_p10, %p70_p9 }
  0x19   :  { %p73_p12 = pnand %p72_p11, %p66_p8 }
  0x85   :  { %v23_v1 = vpop.permute.xlu0 %22 }
  0x86   :  { %24 = vst [vmem:[#allocation5] sm:$0xff] %v23_v1 }
  0x87   :  { %76 = shalt.err (!%p73_p12)
}
  0x88   :  { %s77_s0 = scalar_lea.hbm %s129_s1, 128 }
  0x89   :  { %p78_p13 = scmp.ne.s32.totalorder %s129_s1, %s77_s0  ;;  %p81_p0 = scmp.lt.u32.totalorder %s77_s0, %s129_s1 }
  0x8b   :  { %p83_p1 = pnand %p81_p0, %p78_p13 }
  0x8d   :  { %86 = shalt.err (!%p83_p1)
}
  0x8e   :  { %34 = dma.vmem_to_hbm [thread:$0]  %s32_s20, 128, %s129_s1, [#allocation4]  }
  0x8f   :  { %89 = dma.done.wait [#allocation4], 128  }
  0x90   :  { %90 = vsyncadd [#allocation4], 4294967168 }
  0x91   :  { %38 = vsyncpa [#allocation3], 1 }
  0x92   :  { %39 = vsyncpa [#allocation4], 1 }

</bundles_post_ra>
